<compile_context>
chip_gen: v7x
topology: tpu7x:2x2x1
jax: 0.10.0
libtpu: 0.0.40
codegen_flags: <defaults>
</compile_context>

<pallas_src>
import jax
import jax.numpy as jnp
from jax import lax
from jax.experimental import pallas as pl
from jax.experimental.pallas import tpu as pltpu

_SQRT_HALF = 0.7071067811865476
_MIB = 1024 * 1024


def _gelu_exact(x):
    # nn.GELU default: 0.5 * x * (1 + erf(x / sqrt(2))) — exact erf (no tanh).
    return 0.5 * x * (1.0 + lax.erf(x * _SQRT_HALF))


def _round_up(x, m):
    return ((x + m - 1) // m) * m


def _vmem_capacity_bytes():
    # Generation-aware: v5e/v6e ~128 MiB, v7x ~64 MiB per TensorCore.
    try:
        cap = int(getattr(pltpu.get_tpu_info(), "vmem_capacity_bytes", 0))
        if cap > 0:
            return cap
    except Exception:  # best-effort hardware query
        pass
    return 64 * _MIB  # conservative default (v7x-sized)


def _choose_tm(M, H):
    if M <= 128:
        return max(_round_up(M, 8), 8)
    # Large MXU-aligned row tiles, but (a) avoid heavy row padding (>~12%
    # wasted fc1+GELU+fc2 FLOPs and output DMA for awkward M) and (b) cap at
    # 256 when the (tm, H) f32 intermediate would be large (v5e has a single
    # vst slot; 256 is already fully MXU-aligned on every generation).
    candidates = (512, 256, 128)
    if 512 * H * 4 > 8 * _MIB:
        candidates = (256, 128)
    for cand in candidates:
        if cand > M:
            continue
        Mp = _round_up(M, cand)
        if (Mp - M) / Mp <= 0.125:
            return cand
    return 128


def _vmem_bytes_resident(tm, C_in, H, C_out_p, x_bytes, w_bytes):
    # x/out row tiles are double-buffered by the pipeline; resident weights are
    # single-buffered (constant index_map + Buffered(1)); the (tm, H) fc1
    # intermediate is a kernel-internal temporary counted once, plus a margin.
    xb = 2 * tm * C_in * x_bytes
    wb = (C_in * H + H + H * C_out_p + C_out_p) * w_bytes
    ob = 2 * tm * C_out_p * x_bytes
    hb = tm * H * 4
    return xb + wb + ob + hb + 2 * _MIB


def _vmem_bytes_htiled(tm, th, C_in, C_out_p, x_bytes, w_bytes):
    xb = 2 * tm * C_in * x_bytes
    w1b = 2 * C_in * th * w_bytes
    b1b = 2 * th * w_bytes
    w2b = 2 * th * C_out_p * w_bytes
    b2b = C_out_p * w_bytes
    ob = 2 * tm * C_out_p * x_bytes
    accb = tm * C_out_p * 4
    hb = tm * th * 4
    return xb + w1b + b1b + w2b + b2b + ob + accb + hb + 2 * _MIB


def _mlp_kernel_resident(x_ref, w1_ref, b1_ref, w2_ref, b2_ref, o_ref):
    # fc1 on the MXU with f32 accumulation.
    h = jnp.dot(x_ref[...], w1_ref[...], preferred_element_type=jnp.float32)
    h = _gelu_exact(h + b1_ref[...].astype(jnp.float32))
    # fc2: cast the activation back to the weight dtype (full-rate MXU when the
    # bf16 path is enabled), keep f32 accumulation.
    y = jnp.dot(h.astype(w2_ref.dtype), w2_ref[...],
                preferred_element_type=jnp.float32)
    o_ref[...] = (y + b2_ref[...].astype(jnp.float32)).astype(o_ref.dtype)


def _mlp_kernel_htiled(x_ref, w1_ref, b1_ref, w2_ref, b2_ref, o_ref, acc_ref):
    h_idx = pl.program_id(1)

    @pl.when(h_idx == 0)
    def _init():
        acc_ref[...] = jnp.zeros_like(acc_ref)

    h = jnp.dot(x_ref[...], w1_ref[...], preferred_element_type=jnp.float32)
    h = _gelu_exact(h + b1_ref[...].astype(jnp.float32))
    acc_ref[...] += jnp.dot(h.astype(w2_ref.dtype), w2_ref[...],
                            preferred_element_type=jnp.float32)

    @pl.when(h_idx == pl.num_programs(1) - 1)
    def _finalize():
        o_ref[...] = (acc_ref[...] + b2_ref[...].astype(jnp.float32)
                      ).astype(o_ref.dtype)


def mlp_pallas(x, w1, b1, w2, b2, *, tm=None, th=None, mxu_dtype=None,
               force_h_tiled=False):
    """Mlp forward: GELU(x @ w1 + b1) @ w2 + b2.

    x: (B, N, C_in); w1: (C_in, H); b1: (H,); w2: (H, C_out); b2: (C_out,).
    mxu_dtype: optionally cast the MXU operands (x, w1, w2) to jnp.bfloat16 for
    full-rate MXU on v5e/v6e/v7x (accumulation stays f32). Default None keeps
    the module's f32 numerics exactly.
    """
    B, N, C_in = x.shape
    H = w1.shape[1]
    C_out = w2.shape[1]
    M = B * N
    out_dtype = x.dtype

    if mxu_dtype is not None:
        x = x.astype(mxu_dtype)
        w1 = w1.astype(mxu_dtype)
        w2 = w2.astype(mxu_dtype)

    x_bytes = jnp.dtype(x.dtype).itemsize
    w_bytes = jnp.dtype(w1.dtype).itemsize
    out_bytes = jnp.dtype(out_dtype).itemsize

    # Lane-dense output: pad the out-feature dim to a multiple of 128 so output
    # stores are unmasked. Padded weight columns / bias entries are zero and
    # the padding is sliced off below.
    C_out_p = max(_round_up(C_out, 128), 128)
    if C_out_p != C_out:
        w2 = jnp.pad(w2, ((0, 0), (0, C_out_p - C_out)))
        b2 = jnp.pad(b2, (0, C_out_p - C_out))

    vmem_cap = _vmem_capacity_bytes()
    budget = int(vmem_cap * 0.78)       # ~50 MiB on 64 MiB parts, ~100 on 128
    vmem_limit = int(min(vmem_cap * 0.9, 120 * _MIB))

    if tm is None:
        tm = _choose_tm(M, H)
    tm = max(8, _round_up(tm, 8))

    use_htiled = (force_h_tiled or
                  _vmem_bytes_resident(tm, C_in, H, C_out_p, x_bytes, w_bytes)
                  > budget)

    if use_htiled:
        if th is None:
            th = min(max(_round_up(H, 128), 128), 1024)
            while th > 128 and _vmem_bytes_htiled(
                    tm, th, C_in, C_out_p, x_bytes, w_bytes) > budget:
                th = max(128, th // 2)
        th = max(128, _round_up(th, 128))
        while (tm > 128 and
               _vmem_bytes_htiled(tm, th, C_in, C_out_p, x_bytes, w_bytes)
               > budget):
            tm = max(128, tm // 2)
        H_p = _round_up(H, th)
        if H_p != H:
            # Padded hidden units contribute exactly zero (zero w1 cols, zero
            # b1, zero w2 rows).
            w1 = jnp.pad(w1, ((0, 0), (0, H_p - H)))
            b1 = jnp.pad(b1, (0, H_p - H))
            w2 = jnp.pad(w2, ((0, H_p - H), (0, 0)))
    else:
        H_p = H

    # Pad the token dim so any M works (padded rows are zero, sliced off).
    Mp = _round_up(M, tm)
    x2d = x.reshape(M, C_in)
    if Mp != M:
        x2d = jnp.pad(x2d, ((0, Mp - M), (0, 0)))

    b1_2d = b1.reshape(1, H_p)
    b2_2d = b2.reshape(1, C_out_p)

    flops = 2 * Mp * (C_in * H_p + H_p * C_out_p)
    bytes_accessed = (Mp * C_in * x_bytes
                      + (C_in * H_p + H_p + H_p * C_out_p + C_out_p) * w_bytes
                      + Mp * C_out_p * out_bytes)
    cost = pl.CostEstimate(flops=flops, transcendentals=Mp * H_p,
                           bytes_accessed=bytes_accessed)

    def run(single_buffer_consts):
        def const_spec(shape, index_map):
            # Constant-index operands: one DMA total, one VMEM buffer.
            if single_buffer_consts:
                return pl.BlockSpec(shape, index_map,
                                    pipeline_mode=pl.Buffered(1))
            return pl.BlockSpec(shape, index_map)

        if use_htiled:
            grid = (Mp // tm, H_p // th)
            in_specs = [
                pl.BlockSpec((tm, C_in), lambda i, h: (i, 0)),       # x rows
                pl.BlockSpec((C_in, th), lambda i, h: (0, h)),       # w1 slab
                pl.BlockSpec((1, th), lambda i, h: (0, h)),          # b1 slab
                pl.BlockSpec((th, C_out_p), lambda i, h: (h, 0)),    # w2 slab
                const_spec((1, C_out_p), lambda i, h: (0, 0)),       # b2
            ]
            out_specs = pl.BlockSpec((tm, C_out_p), lambda i, h: (i, 0))
            scratch = [pltpu.VMEM((tm, C_out_p), jnp.float32)]
            kernel = _mlp_kernel_htiled
            semantics = ("parallel", "arbitrary")
        else:
            grid = (Mp // tm,)
            in_specs = [
                pl.BlockSpec((tm, C_in), lambda i: (i, 0)),          # x rows
                const_spec((C_in, H_p), lambda i: (0, 0)),           # w1
                const_spec((1, H_p), lambda i: (0, 0)),              # b1
                const_spec((H_p, C_out_p), lambda i: (0, 0)),        # w2
                const_spec((1, C_out_p), lambda i: (0, 0)),          # b2
            ]
            out_specs = pl.BlockSpec((tm, C_out_p), lambda i: (i, 0))
            scratch = []
            kernel = _mlp_kernel_resident
            semantics = ("parallel",)

        return pl.pallas_call(
            kernel,
            out_shape=jax.ShapeDtypeStruct((Mp, C_out_p), out_dtype),
            grid_spec=pltpu.PrefetchScalarGridSpec(
                num_scalar_prefetch=0,
                grid=grid,
                in_specs=in_specs,
                out_specs=out_specs,
                scratch_shapes=scratch,
            ),
            compiler_params=pltpu.CompilerParams(
                dimension_semantics=semantics,
                vmem_limit_bytes=vmem_limit),
            cost_estimate=cost,
        )(x2d, w1, b1_2d, w2, b2_2d)

    try:
        out2d = run(True)
    except Exception:
        # Fallback if this JAX build rejects Buffered(1): default buffering.
        out2d = run(False)

    return out2d[:M, :C_out].reshape(B, N, C_out)


def mlp_reference(x, w1, b1, w2, b2):
    h = jnp.einsum("bnc,ch->bnh", x, w1) + b1
    h = 0.5 * h * (1.0 + lax.erf(h * _SQRT_HALF))
    return jnp.einsum("bnh,ho->bno", h, w2) + b2


if __name__ == "__main__":
    B, N = 2, 8
    in_features = 32
    hidden_features = 256
    out_features = 32

    key = jax.random.PRNGKey(0)
    kx, kw1, kb1, kw2, kb2 = jax.random.split(key, 5)

    x = jax.random.normal(kx, (B, N, in_features), dtype=jnp.float32)
    # Deterministic synthetic parameters (shapes per nn.Linear in the module,
    # stored transposed: (in, out)).
    w1 = jax.random.normal(kw1, (in_features, hidden_features), jnp.float32) * 0.05
    b1 = jax.random.normal(kb1, (hidden_features,), jnp.float32) * 0.05
    w2 = jax.random.normal(kw2, (hidden_features, out_features), jnp.float32) * 0.05
    b2 = jax.random.normal(kb2, (out_features,), jnp.float32) * 0.05

    ref = mlp_reference(x, w1, b1, w2, b2)

    # Default path: fully resident weights, single row-tile grid axis.
    out = mlp_pallas(x, w1, b1, w2, b2)
    out = jax.block_until_ready(out)
    assert out.shape == (B, N, out_features)
    assert jnp.allclose(out, ref, atol=1e-4, rtol=1e-4)

    # Also exercise the H-tiled accumulator path (used automatically when the
    # resident weights exceed the VMEM budget, e.g. large hidden dims on v7x).
    out_ht = mlp_pallas(x, w1, b1, w2, b2, force_h_tiled=True, th=128)
    out_ht = jax.block_until_ready(out_ht)
    assert out_ht.shape == (B, N, out_features)
    assert jnp.allclose(out_ht, ref, atol=1e-4, rtol=1e-4)

    print("KERNEL_OK")
</pallas_src>

<mosaic_0001>
module attributes {stable_mosaic.version = 11 : i64} {
  func.func @_mlp_kernel_resident(%arg0: i32, %arg1: memref<16x32xf32, #tpu.memory_space<vmem>>, %arg2: memref<32x256xf32, #tpu.memory_space<vmem>>, %arg3: memref<1x256xf32, #tpu.memory_space<vmem>>, %arg4: memref<256x128xf32, #tpu.memory_space<vmem>>, %arg5: memref<1x128xf32, #tpu.memory_space<vmem>>, %arg6: memref<16x128xf32, #tpu.memory_space<vmem>>) attributes {dimension_semantics = [#tpu.dimension_semantics<parallel>], iteration_bounds = array<i64: 1>, scalar_prefetch = 0 : i64, scratch_operands = 0 : i64, tpu.core_type = #tpu.core_type<tc>, window_params = [{transform_indices = @transform_0, window_bounds = array<i64: 16, 32>}, {pipeline_mode = #tpu.pipeline_mode<synchronous>, transform_indices = @transform_1, window_bounds = array<i64: 32, 256>}, {pipeline_mode = #tpu.pipeline_mode<synchronous>, transform_indices = @transform_2, window_bounds = array<i64: 1, 256>}, {pipeline_mode = #tpu.pipeline_mode<synchronous>, transform_indices = @transform_3, window_bounds = array<i64: 256, 128>}, {pipeline_mode = #tpu.pipeline_mode<synchronous>, transform_indices = @transform_4, window_bounds = array<i64: 1, 128>}, {transform_indices = @transform_5, window_bounds = array<i64: 16, 128>}]} {
    %c0 = arith.constant 0 : index
    %c0_0 = arith.constant 0 : index
    %0 = vector.load %arg1[%c0, %c0_0] : memref<16x32xf32, #tpu.memory_space<vmem>>, vector<16x32xf32>
    %c0_1 = arith.constant 0 : index
    %c0_2 = arith.constant 0 : index
    %1 = vector.load %arg2[%c0_1, %c0_2] : memref<32x256xf32, #tpu.memory_space<vmem>>, vector<32x256xf32>
    %cst = arith.constant dense<0.000000e+00> : vector<16x256xf32>
    %2 = tpu.matmul %0, %1, %cst {dimension_numbers = #tpu.dot_dimension_numbers<[1], [0], [0], [1], [0, 0, 1, 1], [], []>} : vector<16x32xf32>, vector<32x256xf32>, vector<16x256xf32> -> vector<16x256xf32>
    %c0_3 = arith.constant 0 : index
    %c0_4 = arith.constant 0 : index
    %3 = vector.load %arg3[%c0_3, %c0_4] : memref<1x256xf32, #tpu.memory_space<vmem>>, vector<1x256xf32>
    %4 = vector.broadcast %3 : vector<1x256xf32> to vector<16x256xf32>
    %5 = arith.addf %2, %4 : vector<16x256xf32>
    %cst_5 = arith.constant 5.000000e-01 : f32
    %6 = vector.broadcast %cst_5 : f32 to vector<16x256xf32>
    %7 = arith.mulf %6, %5 : vector<16x256xf32>
    %cst_6 = arith.constant 0.707106769 : f32
    %8 = vector.broadcast %cst_6 : f32 to vector<16x256xf32>
    %9 = arith.mulf %5, %8 : vector<16x256xf32>
    %10 = math.erf %9 : vector<16x256xf32>
    %cst_7 = arith.constant 1.000000e+00 : f32
    %11 = vector.broadcast %cst_7 : f32 to vector<16x256xf32>
    %12 = arith.addf %11, %10 : vector<16x256xf32>
    %13 = arith.mulf %7, %12 : vector<16x256xf32>
    %c0_8 = arith.constant 0 : index
    %c0_9 = arith.constant 0 : index
    %14 = vector.load %arg4[%c0_8, %c0_9] : memref<256x128xf32, #tpu.memory_space<vmem>>, vector<256x128xf32>
    %cst_10 = arith.constant dense<0.000000e+00> : vector<16x128xf32>
    %15 = tpu.matmul %13, %14, %cst_10 {dimension_numbers = #tpu.dot_dimension_numbers<[1], [0], [0], [1], [0, 0, 1, 1], [], []>} : vector<16x256xf32>, vector<256x128xf32>, vector<16x128xf32> -> vector<16x128xf32>
    %c0_11 = arith.constant 0 : index
    %c0_12 = arith.constant 0 : index
    %16 = vector.load %arg5[%c0_11, %c0_12] : memref<1x128xf32, #tpu.memory_space<vmem>>, vector<1x128xf32>
    %17 = vector.broadcast %16 : vector<1x128xf32> to vector<16x128xf32>
    %18 = arith.addf %15, %17 : vector<16x128xf32>
    %c0_13 = arith.constant 0 : index
    %c0_14 = arith.constant 0 : index
    %19 = vector.load %arg6[%c0_13, %c0_14] : memref<16x128xf32, #tpu.memory_space<vmem>>, vector<16x128xf32>
    tpu.vector_store %arg6[%c0_13, %c0_14], %18 {strides = array<i32>} : memref<16x128xf32, #tpu.memory_space<vmem>>, vector<16x128xf32>,
    return
  }
  func.func @transform_0(%arg0: i32) -> (i32, i32) {
    %c0_i32 = arith.constant 0 : i32
    %c0_i32_0 = arith.constant 0 : i32
    return %arg0, %c0_i32 : i32, i32
  }
  func.func @transform_1(%arg0: i32) -> (i32, i32) {
    %c0_i32 = arith.constant 0 : i32
    %c0_i32_0 = arith.constant 0 : i32
    %c0_i32_1 = arith.constant 0 : i32
    return %c0_i32, %c0_i32_0 : i32, i32
  }
  func.func @transform_2(%arg0: i32) -> (i32, i32) {
    %c0_i32 = arith.constant 0 : i32
    %c0_i32_0 = arith.constant 0 : i32
    %c0_i32_1 = arith.constant 0 : i32
    return %c0_i32, %c0_i32_0 : i32, i32
  }
  func.func @transform_3(%arg0: i32) -> (i32, i32) {
    %c0_i32 = arith.constant 0 : i32
    %c0_i32_0 = arith.constant 0 : i32
    %c0_i32_1 = arith.constant 0 : i32
    return %c0_i32, %c0_i32_0 : i32, i32
  }
  func.func @transform_4(%arg0: i32) -> (i32, i32) {
    %c0_i32 = arith.constant 0 : i32
    %c0_i32_0 = arith.constant 0 : i32
    %c0_i32_1 = arith.constant 0 : i32
    return %c0_i32, %c0_i32_0 : i32, i32
  }
  func.func @transform_5(%arg0: i32) -> (i32, i32) {
    %c0_i32 = arith.constant 0 : i32
    %c0_i32_0 = arith.constant 0 : i32
    return %arg0, %c0_i32 : i32, i32
  }
}

module attributes {stable_mosaic.version = 11 : i64} {
  func.func @_mlp_kernel_resident(%arg0: i32, %arg1: memref<16x32xf32, #tpu.memory_space<vmem>>, %arg2: memref<32x256xf32, #tpu.memory_space<vmem>>, %arg3: memref<1x256xf32, #tpu.memory_space<vmem>>, %arg4: memref<256x128xf32, #tpu.memory_space<vmem>>, %arg5: memref<1x128xf32, #tpu.memory_space<vmem>>, %arg6: memref<16x128xf32, #tpu.memory_space<vmem>>) attributes {dimension_semantics = [#tpu.dimension_semantics<parallel>], iteration_bounds = array<i64: 1>, scalar_prefetch = 0 : i64, scratch_operands = 0 : i64, tpu.core_type = #tpu.core_type<tc>, window_params = [{transform_indices = @transform_0, window_bounds = array<i64: 16, 32>}, {pipeline_mode = #tpu.pipeline_mode<synchronous>, transform_indices = @transform_1, window_bounds = array<i64: 32, 256>}, {pipeline_mode = #tpu.pipeline_mode<synchronous>, transform_indices = @transform_2, window_bounds = array<i64: 1, 256>}, {pipeline_mode = #tpu.pipeline_mode<synchronous>, transform_indices = @transform_3, window_bounds = array<i64: 256, 128>}, {pipeline_mode = #tpu.pipeline_mode<synchronous>, transform_indices = @transform_4, window_bounds = array<i64: 1, 128>}, {transform_indices = @transform_5, window_bounds = array<i64: 16, 128>}]} {
    %c0 = arith.constant 0 : index
    %c0_0 = arith.constant 0 : index
    %0 = vector.load %arg1[%c0, %c0_0] : memref<16x32xf32, #tpu.memory_space<vmem>>, vector<16x32xf32>
    %c0_1 = arith.constant 0 : index
    %c0_2 = arith.constant 0 : index
    %1 = vector.load %arg2[%c0_1, %c0_2] : memref<32x256xf32, #tpu.memory_space<vmem>>, vector<32x256xf32>
    %cst = arith.constant dense<0.000000e+00> : vector<16x256xf32>
    %2 = tpu.matmul %0, %1, %cst {dimension_numbers = #tpu.dot_dimension_numbers<[1], [0], [0], [1], [0, 0, 1, 1], [], []>} : vector<16x32xf32>, vector<32x256xf32>, vector<16x256xf32> -> vector<16x256xf32>
    %c0_3 = arith.constant 0 : index
    %c0_4 = arith.constant 0 : index
    %3 = vector.load %arg3[%c0_3, %c0_4] : memref<1x256xf32, #tpu.memory_space<vmem>>, vector<1x256xf32>
    %4 = vector.broadcast %3 : vector<1x256xf32> to vector<16x256xf32>
    %5 = arith.addf %2, %4 : vector<16x256xf32>
    %cst_5 = arith.constant 5.000000e-01 : f32
    %6 = vector.broadcast %cst_5 : f32 to vector<16x256xf32>
    %7 = arith.mulf %6, %5 : vector<16x256xf32>
    %cst_6 = arith.constant 0.707106769 : f32
    %8 = vector.broadcast %cst_6 : f32 to vector<16x256xf32>
    %9 = arith.mulf %5, %8 : vector<16x256xf32>
    %10 = math.erf %9 : vector<16x256xf32>
    %cst_7 = arith.constant 1.000000e+00 : f32
    %11 = vector.broadcast %cst_7 : f32 to vector<16x256xf32>
    %12 = arith.addf %11, %10 : vector<16x256xf32>
    %13 = arith.mulf %7, %12 : vector<16x256xf32>
    %c0_8 = arith.constant 0 : index
    %c0_9 = arith.constant 0 : index
    %14 = vector.load %arg4[%c0_8, %c0_9] : memref<256x128xf32, #tpu.memory_space<vmem>>, vector<256x128xf32>
    %cst_10 = arith.constant dense<0.000000e+00> : vector<16x128xf32>
    %15 = tpu.matmul %13, %14, %cst_10 {dimension_numbers = #tpu.dot_dimension_numbers<[1], [0], [0], [1], [0, 0, 1, 1], [], []>} : vector<16x256xf32>, vector<256x128xf32>, vector<16x128xf32> -> vector<16x128xf32>
    %c0_11 = arith.constant 0 : index
    %c0_12 = arith.constant 0 : index
    %16 = vector.load %arg5[%c0_11, %c0_12] : memref<1x128xf32, #tpu.memory_space<vmem>>, vector<1x128xf32>
    %17 = vector.broadcast %16 : vector<1x128xf32> to vector<16x128xf32>
    %18 = arith.addf %15, %17 : vector<16x128xf32>
    %c0_13 = arith.constant 0 : index
    %c0_14 = arith.constant 0 : index
    %19 = vector.load %arg6[%c0_13, %c0_14] : memref<16x128xf32, #tpu.memory_space<vmem>>, vector<16x128xf32>
    tpu.vector_store %arg6[%c0_13, %c0_14], %18 {strides = array<i32>} : memref<16x128xf32, #tpu.memory_space<vmem>>, vector<16x128xf32>,
    return
  }
  func.func @transform_0(%arg0: i32) -> (i32, i32) {
    %c0_i32 = arith.constant 0 : i32
    %c0_i32_0 = arith.constant 0 : i32
    return %arg0, %c0_i32 : i32, i32
  }
  func.func @transform_1(%arg0: i32) -> (i32, i32) {
    %c0_i32 = arith.constant 0 : i32
    %c0_i32_0 = arith.constant 0 : i32
    %c0_i32_1 = arith.constant 0 : i32
    return %c0_i32, %c0_i32_0 : i32, i32
  }
  func.func @transform_2(%arg0: i32) -> (i32, i32) {
    %c0_i32 = arith.constant 0 : i32
    %c0_i32_0 = arith.constant 0 : i32
    %c0_i32_1 = arith.constant 0 : i32
    return %c0_i32, %c0_i32_0 : i32, i32
  }
  func.func @transform_3(%arg0: i32) -> (i32, i32) {
    %c0_i32 = arith.constant 0 : i32
    %c0_i32_0 = arith.constant 0 : i32
    %c0_i32_1 = arith.constant 0 : i32
    return %c0_i32, %c0_i32_0 : i32, i32
  }
  func.func @transform_4(%arg0: i32) -> (i32, i32) {
    %c0_i32 = arith.constant 0 : i32
    %c0_i32_0 = arith.constant 0 : i32
    %c0_i32_1 = arith.constant 0 : i32
    return %c0_i32, %c0_i32_0 : i32, i32
  }
  func.func @transform_5(%arg0: i32) -> (i32, i32) {
    %c0_i32 = arith.constant 0 : i32
    %c0_i32_0 = arith.constant 0 : i32
    return %arg0, %c0_i32 : i32, i32
  }
}

</mosaic_0001>

<bundles_post_ra>
// kernel: tpu_custom_call.1
= control target key start
LH: loop header
LB: loop body
LE: loop exit
PB: predicated region body
PF: predicated region fallthrough
CT: control target
= control target key end

     0   :  { %10 = vsyncpa [#allocation3], 0  ;;  %s616_s0 = inlined_call_operand.hbm [shape: f32[16,32], index: 0, kind: input, shape index: {}]   ;;  %s617_s1 = inlined_call_operand.hbm [shape: f32[32,256], index: 1, kind: input, shape index: {}]   ;;  %s618_s2 = inlined_call_operand.vmem [shape: f32[1,256], index: 2, kind: input, shape index: {}]   ;;  %s619_s3 = inlined_call_operand.hbm [shape: f32[256,128], index: 3, kind: input, shape index: {}]   ;;  %s620_s4 = inlined_call_operand.vmem [shape: f32[1,128], index: 4, kind: input, shape index: {}]   ;;  %s621_s5 = inlined_call_operand.hbm [shape: f32[16,128], index: 5, kind: output, shape index: {}]  }
   0x1   :  { %11 = vsyncpa [#allocation6], 0 }
   0x2   :  { %12 = vsyncpa [#allocation4], 0  ;;  %s514_s18 = smov [#allocation5]   ;;  %s420_s22 = scalar_lea.hbm %s617_s1, 1024 }
   0x3   :  { %s30_s19 = sshll.u32 %s514_s18, 4  ;;  %p421_p0 = scmp.ne.s32.totalorder %s617_s1, %s420_s22  ;;  %s31_s19 = int_to_ptr.vmem [resolvable:$true] %s30_s19 }
   0x4   :  { %p424_p1 = scmp.lt.u32.totalorder %s420_s22, %s617_s1 }
   0x6   :  { %p426_p2 = pnand %p424_p1, %p421_p0 }
   0x8   :  { %429 = shalt.err (!%p426_p2)
}
   0x9   :  { %s430_s27 = scalar_lea.vmem %s31_s19, 1024  ;;  %p435_p4 = scmp.lt.s32.totalorder %s31_s19, %s31_s19 }
   0xa   :  { %p431_p3 = scmp.ne.s32.totalorder %s31_s19, %s430_s27  ;;  %p436_p5 = scmp.lt.s32.totalorder %s430_s27, %s430_s27 }
   0xc   :  { %p437_p6 = por %p436_p5, %p435_p4 }
   0xe   :  { %p438_p7 = pnand %p437_p6, %p431_p3 }
  0x10   :  { %441 = shalt.err (!%p438_p7)
}
  0x11   :  { %s515_s28 = smov 256   ;;  %s516_s29 = smov 16  }
  0x12   :  { %36 = dma.hbm_to_vmem [thread:$0]  %s617_s1, 1024, %s31_s19, [#allocation6], %s515_s28, %s515_s28, %s516_s29  }
  0x13   :  { %s517_s7 = smov [#allocation2]   ;;  %s442_s11 = scalar_lea.hbm %s616_s0, 256 }
  0x14   :  { %s18_s8 = sshll.u32 %s517_s7, 4  ;;  %p443_p8 = scmp.ne.s32.totalorder %s616_s0, %s442_s11  ;;  %s19_s8 = int_to_ptr.vmem [resolvable:$true] %s18_s8 }
  0x15   :  { %p446_p9 = scmp.lt.u32.totalorder %s442_s11, %s616_s0 }
  0x17   :  { %p448_p10 = pnand %p446_p9, %p443_p8 }
  0x19   :  { %451 = shalt.err (!%p448_p10)
}
  0x1a   :  { %s452_s16 = scalar_lea.vmem %s19_s8, 256  ;;  %p457_p12 = scmp.lt.s32.totalorder %s19_s8, %s19_s8 }
  0x1b   :  { %p453_p11 = scmp.ne.s32.totalorder %s19_s8, %s452_s16  ;;  %p458_p13 = scmp.lt.s32.totalorder %s452_s16, %s452_s16 }
  0x1d   :  { %p459_p0 = por %p458_p13, %p457_p12 }
  0x1f   :  { %p460_p1 = pnand %p459_p0, %p453_p11 }
  0x21   :  { %463 = shalt.err (!%p460_p1)
}
  0x22   :  { %s518_s1 = smov 128   ;;  %s519_s17 = smov 8  }
  0x23   :  { %24 = dma.hbm_to_vmem [thread:$0]  %s616_s0, 256, %s19_s8, [#allocation3], %s518_s1, %s518_s1, %s519_s17  }
  0x24   :  { %s520_s20 = smov [#allocation7]   ;;  %s464_s24 = scalar_lea.hbm %s619_s3, 4096 }
  0x25   :  { %s44_s21 = sshll.u32 %s520_s20, 4  ;;  %p465_p2 = scmp.ne.s32.totalorder %s619_s3, %s464_s24  ;;  %s45_s21 = int_to_ptr.vmem [resolvable:$true] %s44_s21 }
  0x26   :  { %p468_p3 = scmp.lt.u32.totalorder %s464_s24, %s619_s3 }
  0x28   :  { %p470_p4 = pnand %p468_p3, %p465_p2 }
  0x2a   :  { %473 = shalt.err (!%p470_p4)
}
  0x2b   :  { %s474_s29 = scalar_lea.vmem %s45_s21, 4096  ;;  %p479_p6 = scmp.lt.s32.totalorder %s45_s21, %s45_s21 }
  0x2c   :  { %p475_p5 = scmp.ne.s32.totalorder %s45_s21, %s474_s29  ;;  %p480_p7 = scmp.lt.s32.totalorder %s474_s29, %s474_s29 }
  0x2e   :  { %p481_p8 = por %p480_p7, %p479_p6 }
  0x30   :  { %p482_p9 = pnand %p481_p8, %p475_p5 }
  0x32   :  { %485 = shalt.err (!%p482_p9)
}
  0x33   :  { %50 = dma.hbm_to_vmem [thread:$0]  %s619_s3, 4096, %s45_s21, [#allocation6], %s518_s1, %s518_s1, %s519_s17  }
  0x34   :  { %508 = dma.done.wait [#allocation3], 256  }
  0x35   :  { %509 = vsyncadd [#allocation3], 4294967040 }
  0x36   :  { %510 = dma.done.wait [#allocation6], 5120  }
  0x37   :  { %511 = vsyncadd [#allocation6], 4294962176  ;;  %v521_v0 = vmov 0.0   ;;  %v65_v1 = vld [vmem:[#allocation5 + $0x8] sm:$0xff]  ;;  %v67_v2 = vld [vmem:[#allocation5 + $0x18] sm:$0xff]  ;;  %vm84_vm0 = vcmask 261120   ;;  %v74_v63 = vlaneseq }
  0x38   :  { %155 = vmatprep.mubr.f32.mxu0 %v521_v0  ;;  %v64_v3 = vld [vmem:[#allocation5] sm:$0xff]  ;;  %v363_v4 = vpack.c.bf16 %v67_v2, %v65_v1  ;;  %v66_v5 = vld [vmem:[#allocation5 + $0x10] sm:$0xff]  ;;  %v69_v6 = vld [vmem:[#allocation5 + $0x28] sm:$0xff]  ;;  %s522_s8 = smov [#allocation8]  }
  0x39   :  { %v71_v7 = vld [vmem:[#allocation5 + $0x38] sm:$0xff]  ;;  %v365_v8 = vpack.c.bf16 %v66_v5, %v64_v3  ;;  %v68_v10 = vld [vmem:[#allocation5 + $0x20] sm:$0xff]  ;;  %v70_v11 = vld [vmem:[#allocation5 + $0x30] sm:$0xff]  ;;  %s309_s9 = sshll.u32 %s522_s8, 4  ;;  %s310_s9 = int_to_ptr.vmem [resolvable:$true] %s309_s9 }
  0x3a   :  { %v367_v9 = vpack.c.bf16 %v71_v7, %v69_v6  ;;  %364 = vmatprep.subr.bf16.mxu0 %v363_v4  ;;  %v204_v12 = vld [vmem:[#allocation7 + $0x80] sm:$0xff]  ;;  %v205_v13 = vld [vmem:[#allocation7 + $0x88] sm:$0xff]  ;;  %v369_v14 = vpack.c.bf16 %v70_v11, %v68_v10  ;;  %v206_v18 = vld [vmem:[#allocation7 + $0x90] sm:$0xff]  ;;  %s486_s10 = scalar_lea.vmem %s310_s9, 256  ;;  %p491_p11 = scmp.lt.s32.totalorder %s310_s9, %s310_s9 }
  0x3b   :  { %366 = vmatpush1.bf16.msra.mxu0 %v365_v8  ;;  %v371_v15 = vpack.c.bf16 %v205_v13, %v204_v12  ;;  %v188_v16 = vld [vmem:[#allocation7] sm:$0xff]  ;;  %v189_v17 = vld [vmem:[#allocation7 + $0x8] sm:$0xff]  ;;  %v207_v20 = vld [vmem:[#allocation7 + $0x98] sm:$0xff]  ;;  %p487_p10 = scmp.ne.s32.totalorder %s310_s9, %s486_s10  ;;  %p492_p12 = scmp.lt.s32.totalorder %s486_s10, %s486_s10 }
  0x3c   :  { %368 = vmatprep.subr.bf16.mxu0 %v367_v9  ;;  %v373_v19 = vpack.c.bf16 %v189_v17, %v188_v16  ;;  %v190_v21 = vld [vmem:[#allocation7 + $0x10] sm:$0xff]  ;;  %v191_v22 = vld [vmem:[#allocation7 + $0x18] sm:$0xff]  ;;  %v375_v23 = vpack.c.bf16 %v207_v20, %v206_v18  ;;  %v208_v24 = vld [vmem:[#allocation7 + $0xa0] sm:$0xff] }
  0x3d   :  { %372 = vmatprep.subr.bf16.mxu1 %v371_v15  ;;  %v209_v25 = vld [vmem:[#allocation7 + $0xa8] sm:$0xff]  ;;  %v377_v26 = vpack.c.bf16 %v191_v22, %v190_v21  ;;  %v62_v27 = vld [vmem:[#allocation2] sm:$0xff]  ;;  %v192_v29 = vld [vmem:[#allocation7 + $0x20] sm:$0xff]  ;;  %p493_p13 = por %p492_p12, %p491_p11 }
  0x3e   :  { %374 = vmatpush3.bf16.msra.mxu1 %v373_v19  ;;  %v379_v28 = vpack.c.bf16 %v209_v25, %v208_v24  ;;  %v193_v30 = vld [vmem:[#allocation7 + $0x28] sm:$0xff]  ;;  %v63_v32 = vld [vmem:[#allocation2 + $0x8] sm:$0xff]  ;;  %v210_v33 = vld [vmem:[#allocation7 + $0xb0] sm:$0xff] }
  0x3f   :  { %370 = vmatpush1.bf16.msra.mxu0 %v369_v14  ;;  %376 = vmatprep.subr.bf16.mxu1 %v375_v23  ;;  %v381_v31 = vpack.c.bf16 %v193_v30, %v192_v29  ;;  %v211_v34 = vld [vmem:[#allocation7 + $0xb8] sm:$0xff]  ;;  %v194_v36 = vld [vmem:[#allocation7 + $0x30] sm:$0xff]  ;;  %v212_v39 = vld [vmem:[#allocation7 + $0xc0] sm:$0xff]  ;;  %p494_p0 = pnand %p493_p13, %p487_p10 }
  0x40   :  { %v383_v35 = vpack.c.bf16 %v211_v34, %v210_v33  ;;  %v195_v37 = vld [vmem:[#allocation7 + $0x38] sm:$0xff]  ;;  %v213_v40 = vld [vmem:[#allocation7 + $0xc8] sm:$0xff]  ;;  %v196_v42 = vld [vmem:[#allocation7 + $0x40] sm:$0xff] }
  0x41   :  { %v385_v38 = vpack.c.bf16 %v195_v37, %v194_v36  ;;  %v387_v41 = vpack.c.bf16 %v213_v40, %v212_v39  ;;  %v197_v43 = vld [vmem:[#allocation7 + $0x48] sm:$0xff]  ;;  %v214_v45 = vld [vmem:[#allocation7 + $0xd0] sm:$0xff]  ;;  %v215_v46 = vld [vmem:[#allocation7 + $0xd8] sm:$0xff] }
  0x42   :  { %322 = vmatmul.mubr.msk.f32.vlgmr.msra.gmra.mrb[0].mxu0 %vm84_vm0, %v62_v27  ;;  %378 = vmatpush3.bf16.msra.mxu1 %v377_v26  ;;  %v389_v44 = vpack.c.bf16 %v197_v43, %v196_v42  ;;  %v391_v47 = vpack.c.bf16 %v215_v46, %v214_v45  ;;  %v198_v48 = vld [vmem:[#allocation7 + $0x50] sm:$0xff]  ;;  %v199_v49 = vld [vmem:[#allocation7 + $0x58] sm:$0xff]  ;;  %v216_v51 = vld [vmem:[#allocation7 + $0xe0] sm:$0xff] }
  0x43   :  { %161 = vmatprep.mubr.f32.mxu0 %v521_v0  ;;  %380 = vmatprep.subr.bf16.mxu1 %v379_v28  ;;  %v393_v50 = vpack.c.bf16 %v199_v49, %v198_v48  ;;  %v217_v52 = vld [vmem:[#allocation7 + $0xe8] sm:$0xff]  ;;  %v200_v54 = vld [vmem:[#allocation7 + $0x60] sm:$0xff]  ;;  %v218_v57 = vld [vmem:[#allocation7 + $0xf0] sm:$0xff]  ;;  %v75_v0 = vshrl.u32 %v74_v63, 7 }
  0x44   :  { %v395_v53 = vpack.c.bf16 %v217_v52, %v216_v51  ;;  %v201_v55 = vld [vmem:[#allocation7 + $0x68] sm:$0xff]  ;;  %v219_v58 = vld [vmem:[#allocation7 + $0xf8] sm:$0xff]  ;;  %v202_v60 = vld [vmem:[#allocation7 + $0x70] sm:$0xff] }
  0x45   :  { %v397_v56 = vpack.c.bf16 %v201_v55, %v200_v54  ;;  %v399_v59 = vpack.c.bf16 %v219_v58, %v218_v57  ;;  %v203_v61 = vld [vmem:[#allocation7 + $0x78] sm:$0xff]  ;;  %v76_v1 = vsub.s32 0, %v75_v0  ;;  %v72_v2 = vld [vmem:[%s618_s2] sm:$0x3]  ;;  %v80_v3 = vsub.s32 1, %v75_v0 }
  0x46   :  { %323 = vmatmul.mubr.msk.f32.gmra.mrb[2].mxu0 %vm84_vm0, %v63_v32  ;;  %382 = vmatpush3.bf16.msra.mxu1 %v381_v31  ;;  %v401_v62 = vpack.c.bf16 %v203_v61, %v202_v60 }
  0x47   :  { %384 = vmatprep.subr.bf16.mxu1 %v383_v35  ;;  %v77_v4 = vrot.slane %v72_v2, %v76_v1  ;;  %v81_v5 = vrot.slane %v72_v2, %v80_v3  ;;  %v324_v35 = vld [vmem:[%s620_s4] ss:$0 sm:$0xff] }
  0x4a   :  { %386 = vmatpush3.bf16.msra.mxu1 %v385_v38 }
  0x4b   :  { %388 = vmatprep.subr.bf16.mxu1 %v387_v41 }
  0x4e   :  { %390 = vmatpush3.bf16.msra.mxu1 %v389_v44 }
  0x4f   :  { %392 = vmatprep.subr.bf16.mxu1 %v391_v47 }
  0x52   :  { %394 = vmatpush3.bf16.msra.mxu1 %v393_v50 }
  0x53   :  { %396 = vmatprep.subr.bf16.mxu1 %v395_v53 }
  0x56   :  { %398 = vmatpush3.bf16.msra.mxu1 %v397_v56 }
  0x57   :  { %400 = vmatprep.subr.bf16.mxu1 %v399_v59 }
  0x5a   :  { %402 = vmatpush3.bf16.msra.mxu1 %v401_v62 }
 0x115   :  { %v157_v6 = vpop.f32.mrb[0].mxu0 }
 0x116   :  { %v158_v7 = vadd.f32 %v157_v6, %v77_v4  ;;  %v159_v8 = vpop.f32.mrb[1].mxu0 }
 0x117   :  { %v160_v9 = vadd.f32 %v159_v8, %v81_v5 }
 0x118   :  { %v172_v10 = vmul.f32 0.70710677, %v158_v7  ;;  %v168_v23 = vmul.f32 0.5, %v158_v7 }
 0x119   :  { %v173_v11 = vmul.f32 0.70710677, %v160_v9  ;;  %v163_v12 = vpop.f32.mrb[2].mxu0  ;;  %v169_v21 = vmul.f32 0.5, %v160_v9 }
 0x11a   :  { %412 = verf.f32 %v172_v10  ;;  %v164_v13 = vadd.f32 %v163_v12, %v77_v4  ;;  %v165_v14 = vpop.f32.mrb[3].mxu0 }
 0x11b   :  { %414 = verf.f32 %v173_v11  ;;  %v166_v15 = vadd.f32 %v165_v14, %v81_v5 }
 0x11c   :  { %v174_v16 = vmul.f32 0.70710677, %v164_v13  ;;  %v170_v31 = vmul.f32 0.5, %v164_v13 }
 0x11d   :  { %v175_v17 = vmul.f32 0.70710677, %v166_v15  ;;  %v171_v29 = vmul.f32 0.5, %v166_v15 }
 0x11e   :  { %416 = verf.f32 %v174_v16 }
 0x11f   :  { %418 = verf.f32 %v175_v17 }
 0x124   :  { %v413_v18 = vpop.eup %412 }
 0x125   :  { %v415_v19 = vpop.eup %414  ;;  %v180_v20 = vadd.f32 1.0, %v413_v18 }
 0x126   :  { %v181_v22 = vadd.f32 1.0, %v415_v19 }
 0x127   :  { %v184_v28 = vmul.f32 %v180_v20, %v168_v23 }
 0x128   :  { %v417_v24 = vpop.eup %416  ;;  %v185_v25 = vmul.f32 %v181_v22, %v169_v21 }
 0x129   :  { %v419_v26 = vpop.eup %418  ;;  %v182_v27 = vadd.f32 1.0, %v417_v24 }
 0x12a   :  { %v183_v30 = vadd.f32 1.0, %v419_v26  ;;  %291 = vmatprep.mubr.f32.mxu1 %v185_v25 }
 0x12b   :  { %292 = vmatmul.mubr.f32.vlgmr.msra.gmra.mrb[0].mxu1 %v184_v28  ;;  %v186_v33 = vmul.f32 %v182_v27, %v170_v31 }
 0x12c   :  { %v187_v32 = vmul.f32 %v183_v30, %v171_v29 }
 0x12e   :  { %296 = vmatprep.mubr.f32.mxu1 %v187_v32 }
 0x12f   :  { %297 = vmatmul.mubr.f32.gmra.mrb[2].mxu1 %v186_v33 }
 0x1fe   :  { %v357_v34 = vpop.f32.mrb[0].mxu1 }
 0x1ff   :  { %v358_v36 = vpop.f32.mrb[1].mxu1 }
 0x200   :  { %v359_v37 = vadd.f32 %v358_v36, %v357_v34 }
 0x202   :  { %v294_v38 = vadd.f32 %v359_v37, %v324_v35  ;;  %v360_v39 = vpop.f32.mrb[2].mxu1 }
 0x203   :  { %v361_v40 = vpop.f32.mrb[3].mxu1 }
 0x204   :  { %302 = vst [vmem:[#allocation8] sm:$0xff] %v294_v38  ;;  %v362_v41 = vadd.f32 %v361_v40, %v360_v39 }
 0x206   :  { %v299_v42 = vadd.f32 %v362_v41, %v324_v35 }
 0x208   :  { %303 = vst [vmem:[#allocation8 + $0x8] sm:$0xff] %v299_v42 }
 0x209   :  { %497 = shalt.err (!%p494_p0)
}
 0x20a   :  { %s498_s12 = scalar_lea.hbm %s621_s5, 256 }
 0x20b   :  { %p499_p1 = scmp.ne.s32.totalorder %s621_s5, %s498_s12  ;;  %p502_p2 = scmp.lt.u32.totalorder %s498_s12, %s621_s5 }
 0x20d   :  { %p504_p3 = pnand %p502_p2, %p499_p1 }
 0x20f   :  { %507 = shalt.err (!%p504_p3)
}
 0x210   :  { %315 = dma.vmem_to_hbm [thread:$0]  %s310_s9, 256, %s621_s5, [#allocation4], %s518_s1, %s518_s1, %s519_s17  }
 0x211   :  { %512 = dma.done.wait [#allocation4], 256  }
 0x212   :  { %513 = vsyncadd [#allocation4], 4294967040 }
 0x213   :  { %319 = vsyncpa [#allocation3], 1 }
 0x214   :  { %320 = vsyncpa [#allocation6], 1 }
 0x215   :  { %321 = vsyncpa [#allocation4], 1 }

// kernel: tpu_custom_call.1
= control target key start
LH: loop header
LB: loop body
LE: loop exit
PB: predicated region body
PF: predicated region fallthrough
CT: control target
= control target key end

     0   :  { %10 = vsyncpa [#allocation3], 0  ;;  %s616_s0 = inlined_call_operand.hbm [shape: f32[16,32], index: 0, kind: input, shape index: {}]   ;;  %s617_s1 = inlined_call_operand.hbm [shape: f32[32,256], index: 1, kind: input, shape index: {}]   ;;  %s618_s2 = inlined_call_operand.vmem [shape: f32[1,256], index: 2, kind: input, shape index: {}]   ;;  %s619_s3 = inlined_call_operand.hbm [shape: f32[256,128], index: 3, kind: input, shape index: {}]   ;;  %s620_s4 = inlined_call_operand.vmem [shape: f32[1,128], index: 4, kind: input, shape index: {}]   ;;  %s621_s5 = inlined_call_operand.hbm [shape: f32[16,128], index: 5, kind: output, shape index: {}]  }
   0x1   :  { %11 = vsyncpa [#allocation6], 0 }
   0x2   :  { %12 = vsyncpa [#allocation4], 0  ;;  %s514_s18 = smov [#allocation5]   ;;  %s420_s22 = scalar_lea.hbm %s617_s1, 1024 }
   0x3   :  { %s30_s19 = sshll.u32 %s514_s18, 4  ;;  %p421_p0 = scmp.ne.s32.totalorder %s617_s1, %s420_s22  ;;  %s31_s19 = int_to_ptr.vmem [resolvable:$true] %s30_s19 }
   0x4   :  { %p424_p1 = scmp.lt.u32.totalorder %s420_s22, %s617_s1 }
   0x6   :  { %p426_p2 = pnand %p424_p1, %p421_p0 }
   0x8   :  { %429 = shalt.err (!%p426_p2)
}
   0x9   :  { %s430_s27 = scalar_lea.vmem %s31_s19, 1024  ;;  %p435_p4 = scmp.lt.s32.totalorder %s31_s19, %s31_s19 }
   0xa   :  { %p431_p3 = scmp.ne.s32.totalorder %s31_s19, %s430_s27  ;;  %p436_p5 = scmp.lt.s32.totalorder %s430_s27, %s430_s27 }
   0xc   :  { %p437_p6 = por %p436_p5, %p435_p4 }
   0xe   :  { %p438_p7 = pnand %p437_p6, %p431_p3 }
  0x10   :  { %441 = shalt.err (!%p438_p7)
}
  0x11   :  { %s515_s28 = smov 256   ;;  %s516_s29 = smov 16  }
  0x12   :  { %36 = dma.hbm_to_vmem [thread:$0]  %s617_s1, 1024, %s31_s19, [#allocation6], %s515_s28, %s515_s28, %s516_s29  }
  0x13   :  { %s517_s7 = smov [#allocation2]   ;;  %s442_s11 = scalar_lea.hbm %s616_s0, 256 }
  0x14   :  { %s18_s8 = sshll.u32 %s517_s7, 4  ;;  %p443_p8 = scmp.ne.s32.totalorder %s616_s0, %s442_s11  ;;  %s19_s8 = int_to_ptr.vmem [resolvable:$true] %s18_s8 }
  0x15   :  { %p446_p9 = scmp.lt.u32.totalorder %s442_s11, %s616_s0 }
  0x17   :  { %p448_p10 = pnand %p446_p9, %p443_p8 }
  0x19   :  { %451 = shalt.err (!%p448_p10)
}
  0x1a   :  { %s452_s16 = scalar_lea.vmem %s19_s8, 256  ;;  %p457_p12 = scmp.lt.s32.totalorder %s19_s8, %s19_s8 }
  0x1b   :  { %p453_p11 = scmp.ne.s32.totalorder %s19_s8, %s452_s16  ;;  %p458_p13 = scmp.lt.s32.totalorder %s452_s16, %s452_s16 }
  0x1d   :  { %p459_p0 = por %p458_p13, %p457_p12 }
  0x1f   :  { %p460_p1 = pnand %p459_p0, %p453_p11 }
  0x21   :  { %463 = shalt.err (!%p460_p1)
}
  0x22   :  { %s518_s1 = smov 128   ;;  %s519_s17 = smov 8  }
  0x23   :  { %24 = dma.hbm_to_vmem [thread:$0]  %s616_s0, 256, %s19_s8, [#allocation3], %s518_s1, %s518_s1, %s519_s17  }
  0x24   :  { %s520_s20 = smov [#allocation7]   ;;  %s464_s24 = scalar_lea.hbm %s619_s3, 4096 }
  0x25   :  { %s44_s21 = sshll.u32 %s520_s20, 4  ;;  %p465_p2 = scmp.ne.s32.totalorder %s619_s3, %s464_s24  ;;  %s45_s21 = int_to_ptr.vmem [resolvable:$true] %s44_s21 }
  0x26   :  { %p468_p3 = scmp.lt.u32.totalorder %s464_s24, %s619_s3 }
  0x28   :  { %p470_p4 = pnand %p468_p3, %p465_p2 }
  0x2a   :  { %473 = shalt.err (!%p470_p4)
}
  0x2b   :  { %s474_s29 = scalar_lea.vmem %s45_s21, 4096  ;;  %p479_p6 = scmp.lt.s32.totalorder %s45_s21, %s45_s21 }
  0x2c   :  { %p475_p5 = scmp.ne.s32.totalorder %s45_s21, %s474_s29  ;;  %p480_p7 = scmp.lt.s32.totalorder %s474_s29, %s474_s29 }
  0x2e   :  { %p481_p8 = por %p480_p7, %p479_p6 }
  0x30   :  { %p482_p9 = pnand %p481_p8, %p475_p5 }
  0x32   :  { %485 = shalt.err (!%p482_p9)
}
  0x33   :  { %50 = dma.hbm_to_vmem [thread:$0]  %s619_s3, 4096, %s45_s21, [#allocation6], %s518_s1, %s518_s1, %s519_s17  }
  0x34   :  { %508 = dma.done.wait [#allocation3], 256  }
  0x35   :  { %509 = vsyncadd [#allocation3], 4294967040 }
  0x36   :  { %510 = dma.done.wait [#allocation6], 5120  }
  0x37   :  { %511 = vsyncadd [#allocation6], 4294962176  ;;  %v521_v0 = vmov 0.0   ;;  %v65_v1 = vld [vmem:[#allocation5 + $0x8] sm:$0xff]  ;;  %v67_v2 = vld [vmem:[#allocation5 + $0x18] sm:$0xff]  ;;  %vm84_vm0 = vcmask 261120   ;;  %v74_v63 = vlaneseq }
  0x38   :  { %155 = vmatprep.mubr.f32.mxu0 %v521_v0  ;;  %v64_v3 = vld [vmem:[#allocation5] sm:$0xff]  ;;  %v363_v4 = vpack.c.bf16 %v67_v2, %v65_v1  ;;  %v66_v5 = vld [vmem:[#allocation5 + $0x10] sm:$0xff]  ;;  %v69_v6 = vld [vmem:[#allocation5 + $0x28] sm:$0xff]  ;;  %s522_s8 = smov [#allocation8]  }
  0x39   :  { %v71_v7 = vld [vmem:[#allocation5 + $0x38] sm:$0xff]  ;;  %v365_v8 = vpack.c.bf16 %v66_v5, %v64_v3  ;;  %v68_v10 = vld [vmem:[#allocation5 + $0x20] sm:$0xff]  ;;  %v70_v11 = vld [vmem:[#allocation5 + $0x30] sm:$0xff]  ;;  %s309_s9 = sshll.u32 %s522_s8, 4  ;;  %s310_s9 = int_to_ptr.vmem [resolvable:$true] %s309_s9 }
  0x3a   :  { %v367_v9 = vpack.c.bf16 %v71_v7, %v69_v6  ;;  %364 = vmatprep.subr.bf16.mxu0 %v363_v4  ;;  %v204_v12 = vld [vmem:[#allocation7 + $0x80] sm:$0xff]  ;;  %v205_v13 = vld [vmem:[#allocation7 + $0x88] sm:$0xff]  ;;  %v369_v14 = vpack.c.bf16 %v70_v11, %v68_v10  ;;  %v206_v18 = vld [vmem:[#allocation7 + $0x90] sm:$0xff]  ;;  %s486_s10 = scalar_lea.vmem %s310_s9, 256  ;;  %p491_p11 = scmp.lt.s32.totalorder %s310_s9, %s310_s9 }
  0x3b   :  { %366 = vmatpush1.bf16.msra.mxu0 %v365_v8  ;;  %v371_v15 = vpack.c.bf16 %v205_v13, %v204_v12  ;;  %v188_v16 = vld [vmem:[#allocation7] sm:$0xff]  ;;  %v189_v17 = vld [vmem:[#allocation7 + $0x8] sm:$0xff]  ;;  %v207_v20 = vld [vmem:[#allocation7 + $0x98] sm:$0xff]  ;;  %p487_p10 = scmp.ne.s32.totalorder %s310_s9, %s486_s10  ;;  %p492_p12 = scmp.lt.s32.totalorder %s486_s10, %s486_s10 }
  0x3c   :  { %368 = vmatprep.subr.bf16.mxu0 %v367_v9  ;;  %v373_v19 = vpack.c.bf16 %v189_v17, %v188_v16  ;;  %v190_v21 = vld [vmem:[#allocation7 + $0x10] sm:$0xff]  ;;  %v191_v22 = vld [vmem:[#allocation7 + $0x18] sm:$0xff]  ;;  %v375_v23 = vpack.c.bf16 %v207_v20, %v206_v18  ;;  %v208_v24 = vld [vmem:[#allocation7 + $0xa0] sm:$0xff] }
  0x3d   :  { %372 = vmatprep.subr.bf16.mxu1 %v371_v15  ;;  %v209_v25 = vld [vmem:[#allocation7 + $0xa8] sm:$0xff]  ;;  %v377_v26 = vpack.c.bf16 %v191_v22, %v190_v21  ;;  %v62_v27 = vld [vmem:[#allocation2] sm:$0xff]  ;;  %v192_v29 = vld [vmem:[#allocation7 + $0x20] sm:$0xff]  ;;  %p493_p13 = por %p492_p12, %p491_p11 }
  0x3e   :  { %374 = vmatpush3.bf16.msra.mxu1 %v373_v19  ;;  %v379_v28 = vpack.c.bf16 %v209_v25, %v208_v24  ;;  %v193_v30 = vld [vmem:[#allocation7 + $0x28] sm:$0xff]  ;;  %v63_v32 = vld [vmem:[#allocation2 + $0x8] sm:$0xff]  ;;  %v210_v33 = vld [vmem:[#allocation7 + $0xb0] sm:$0xff] }
  0x3f   :  { %370 = vmatpush1.bf16.msra.mxu0 %v369_v14  ;;  %376 = vmatprep.subr.bf16.mxu1 %v375_v23  ;;  %v381_v31 = vpack.c.bf16 %v193_v30, %v192_v29  ;;  %v211_v34 = vld [vmem:[#allocation7 + $0xb8] sm:$0xff]  ;;  %v194_v36 = vld [vmem:[#allocation7 + $0x30] sm:$0xff]  ;;  %v212_v39 = vld [vmem:[#allocation7 + $0xc0] sm:$0xff]  ;;  %p494_p0 = pnand %p493_p13, %p487_p10 }
  0x40   :  { %v383_v35 = vpack.c.bf16 %v211_v34, %v210_v33  ;;  %v195_v37 = vld [vmem:[#allocation7 + $0x38] sm:$0xff]  ;;  %v213_v40 = vld [vmem:[#allocation7 + $0xc8] sm:$0xff]  ;;  %v196_v42 = vld [vmem:[#allocation7 + $0x40] sm:$0xff] }
  0x41   :  { %v385_v38 = vpack.c.bf16 %v195_v37, %v194_v36  ;;  %v387_v41 = vpack.c.bf16 %v213_v40, %v212_v39  ;;  %v197_v43 = vld [vmem:[#allocation7 + $0x48] sm:$0xff]  ;;  %v214_v45 = vld [vmem:[#allocation7 + $0xd0] sm:$0xff]  ;;  %v215_v46 = vld [vmem:[#allocation7 + $0xd8] sm:$0xff] }
  0x42   :  { %322 = vmatmul.mubr.msk.f32.vlgmr.msra.gmra.mrb[0].mxu0 %vm84_vm0, %v62_v27  ;;  %378 = vmatpush3.bf16.msra.mxu1 %v377_v26  ;;  %v389_v44 = vpack.c.bf16 %v197_v43, %v196_v42  ;;  %v391_v47 = vpack.c.bf16 %v215_v46, %v214_v45  ;;  %v198_v48 = vld [vmem:[#allocation7 + $0x50] sm:$0xff]  ;;  %v199_v49 = vld [vmem:[#allocation7 + $0x58] sm:$0xff]  ;;  %v216_v51 = vld [vmem:[#allocation7 + $0xe0] sm:$0xff] }
  0x43   :  { %161 = vmatprep.mubr.f32.mxu0 %v521_v0  ;;  %380 = vmatprep.subr.bf16.mxu1 %v379_v28  ;;  %v393_v50 = vpack.c.bf16 %v199_v49, %v198_v48  ;;  %v217_v52 = vld [vmem:[#allocation7 + $0xe8] sm:$0xff]  ;;  %v200_v54 = vld [vmem:[#allocation7 + $0x60] sm:$0xff]  ;;  %v218_v57 = vld [vmem:[#allocation7 + $0xf0] sm:$0xff]  ;;  %v75_v0 = vshrl.u32 %v74_v63, 7 }
  0x44   :  { %v395_v53 = vpack.c.bf16 %v217_v52, %v216_v51  ;;  %v201_v55 = vld [vmem:[#allocation7 + $0x68] sm:$0xff]  ;;  %v219_v58 = vld [vmem:[#allocation7 + $0xf8] sm:$0xff]  ;;  %v202_v60 = vld [vmem:[#allocation7 + $0x70] sm:$0xff] }
  0x45   :  { %v397_v56 = vpack.c.bf16 %v201_v55, %v200_v54  ;;  %v399_v59 = vpack.c.bf16 %v219_v58, %v218_v57  ;;  %v203_v61 = vld [vmem:[#allocation7 + $0x78] sm:$0xff]  ;;  %v76_v1 = vsub.s32 0, %v75_v0  ;;  %v72_v2 = vld [vmem:[%s618_s2] sm:$0x3]  ;;  %v80_v3 = vsub.s32 1, %v75_v0 }
  0x46   :  { %323 = vmatmul.mubr.msk.f32.gmra.mrb[2].mxu0 %vm84_vm0, %v63_v32  ;;  %382 = vmatpush3.bf16.msra.mxu1 %v381_v31  ;;  %v401_v62 = vpack.c.bf16 %v203_v61, %v202_v60 }
  0x47   :  { %384 = vmatprep.subr.bf16.mxu1 %v383_v35  ;;  %v77_v4 = vrot.slane %v72_v2, %v76_v1  ;;  %v81_v5 = vrot.slane %v72_v2, %v80_v3  ;;  %v324_v35 = vld [vmem:[%s620_s4] ss:$0 sm:$0xff] }
  0x4a   :  { %386 = vmatpush3.bf16.msra.mxu1 %v385_v38 }
  0x4b   :  { %388 = vmatprep.subr.bf16.mxu1 %v387_v41 }
  0x4e   :  { %390 = vmatpush3.bf16.msra.mxu1 %v389_v44 }
  0x4f   :  { %392 = vmatprep.subr.bf16.mxu1 %v391_v47 }
  0x52   :  { %394 = vmatpush3.bf16.msra.mxu1 %v393_v50 }
  0x53   :  { %396 = vmatprep.subr.bf16.mxu1 %v395_v53 }
  0x56   :  { %398 = vmatpush3.bf16.msra.mxu1 %v397_v56 }
  0x57   :  { %400 = vmatprep.subr.bf16.mxu1 %v399_v59 }
  0x5a   :  { %402 = vmatpush3.bf16.msra.mxu1 %v401_v62 }
 0x115   :  { %v157_v6 = vpop.f32.mrb[0].mxu0 }
 0x116   :  { %v158_v7 = vadd.f32 %v157_v6, %v77_v4  ;;  %v159_v8 = vpop.f32.mrb[1].mxu0 }
 0x117   :  { %v160_v9 = vadd.f32 %v159_v8, %v81_v5 }
 0x118   :  { %v172_v10 = vmul.f32 0.70710677, %v158_v7  ;;  %v168_v23 = vmul.f32 0.5, %v158_v7 }
 0x119   :  { %v173_v11 = vmul.f32 0.70710677, %v160_v9  ;;  %v163_v12 = vpop.f32.mrb[2].mxu0  ;;  %v169_v21 = vmul.f32 0.5, %v160_v9 }
 0x11a   :  { %412 = verf.f32 %v172_v10  ;;  %v164_v13 = vadd.f32 %v163_v12, %v77_v4  ;;  %v165_v14 = vpop.f32.mrb[3].mxu0 }
 0x11b   :  { %414 = verf.f32 %v173_v11  ;;  %v166_v15 = vadd.f32 %v165_v14, %v81_v5 }
 0x11c   :  { %v174_v16 = vmul.f32 0.70710677, %v164_v13  ;;  %v170_v31 = vmul.f32 0.5, %v164_v13 }
 0x11d   :  { %v175_v17 = vmul.f32 0.70710677, %v166_v15  ;;  %v171_v29 = vmul.f32 0.5, %v166_v15 }
 0x11e   :  { %416 = verf.f32 %v174_v16 }
 0x11f   :  { %418 = verf.f32 %v175_v17 }
 0x124   :  { %v413_v18 = vpop.eup %412 }
 0x125   :  { %v415_v19 = vpop.eup %414  ;;  %v180_v20 = vadd.f32 1.0, %v413_v18 }
 0x126   :  { %v181_v22 = vadd.f32 1.0, %v415_v19 }
 0x127   :  { %v184_v28 = vmul.f32 %v180_v20, %v168_v23 }
 0x128   :  { %v417_v24 = vpop.eup %416  ;;  %v185_v25 = vmul.f32 %v181_v22, %v169_v21 }
 0x129   :  { %v419_v26 = vpop.eup %418  ;;  %v182_v27 = vadd.f32 1.0, %v417_v24 }
 0x12a   :  { %v183_v30 = vadd.f32 1.0, %v419_v26  ;;  %291 = vmatprep.mubr.f32.mxu1 %v185_v25 }
 0x12b   :  { %292 = vmatmul.mubr.f32.vlgmr.msra.gmra.mrb[0].mxu1 %v184_v28  ;;  %v186_v33 = vmul.f32 %v182_v27, %v170_v31 }
 0x12c   :  { %v187_v32 = vmul.f32 %v183_v30, %v171_v29 }
 0x12e   :  { %296 = vmatprep.mubr.f32.mxu1 %v187_v32 }
 0x12f   :  { %297 = vmatmul.mubr.f32.gmra.mrb[2].mxu1 %v186_v33 }
 0x1fe   :  { %v357_v34 = vpop.f32.mrb[0].mxu1 }
 0x1ff   :  { %v358_v36 = vpop.f32.mrb[1].mxu1 }
 0x200   :  { %v359_v37 = vadd.f32 %v358_v36, %v357_v34 }
 0x202   :  { %v294_v38 = vadd.f32 %v359_v37, %v324_v35  ;;  %v360_v39 = vpop.f32.mrb[2].mxu1 }
 0x203   :  { %v361_v40 = vpop.f32.mrb[3].mxu1 }
 0x204   :  { %302 = vst [vmem:[#allocation8] sm:$0xff] %v294_v38  ;;  %v362_v41 = vadd.f32 %v361_v40, %v360_v39 }
 0x206   :  { %v299_v42 = vadd.f32 %v362_v41, %v324_v35 }
 0x208   :  { %303 = vst [vmem:[#allocation8 + $0x8] sm:$0xff] %v299_v42 }
 0x209   :  { %497 = shalt.err (!%p494_p0)
}
 0x20a   :  { %s498_s12 = scalar_lea.hbm %s621_s5, 256 }
 0x20b   :  { %p499_p1 = scmp.ne.s32.totalorder %s621_s5, %s498_s12  ;;  %p502_p2 = scmp.lt.u32.totalorder %s498_s12, %s621_s5 }
 0x20d   :  { %p504_p3 = pnand %p502_p2, %p499_p1 }
 0x20f   :  { %507 = shalt.err (!%p504_p3)
}
 0x210   :  { %315 = dma.vmem_to_hbm [thread:$0]  %s310_s9, 256, %s621_s5, [#allocation4], %s518_s1, %s518_s1, %s519_s17  }
 0x211   :  { %512 = dma.done.wait [#allocation4], 256  }
 0x212   :  { %513 = vsyncadd [#allocation4], 4294967040 }
 0x213   :  { %319 = vsyncpa [#allocation3], 1 }
 0x214   :  { %320 = vsyncpa [#allocation6], 1 }
 0x215   :  { %321 = vsyncpa [#allocation4], 1 }

</bundles_post_ra>
